<compile_context>
chip_gen: v7x
topology: tpu7x:2x2x1
jax: 0.10.0
libtpu: 0.0.40
codegen_flags: <defaults>
</compile_context>

<pallas_src>
import jax
import jax.numpy as jnp
from jax.experimental import pallas as pl
from jax.experimental.pallas import tpu as pltpu


def _locked_dropout_kernel(mask_ref, x_ref, o_ref):
    # mask_ref: (1, LC) broadcast over the TT sublane rows of the x tile.
    # Single multiply per element in x.dtype (bf16 VALU native on v6e/v7x).
    o_ref[...] = x_ref[...] * mask_ref[...]


def _vmem_capacity_bytes():
    """Physical VMEM per TensorCore; conservative fallback is safe on all gens."""
    try:
        cap = getattr(pltpu.get_tpu_info(), "vmem_capacity_bytes", None)
        if cap:
            return int(cap)
    except Exception:
        pass
    return 64 << 20  # v7x per-TC VMEM (the smallest of v5e / v6e / v7x)


def _sublane_multiple(dtype):
    # Native sublane packing: 8 rows for 4-byte, 16 for 2-byte, 32 for 1-byte.
    return max(8, 32 // max(1, jnp.dtype(dtype).itemsize))


def _pick_tiles(T2, W, itemsize, sub, target_bytes):
    """Choose (TT, LC): sublane-aligned row tile and 128-aligned lane tile."""
    # Lane axis: only tile it if even the minimum-height block blows the budget.
    if W <= 128 or sub * W * itemsize <= target_bytes:
        LC = W  # full lane extent (legal even when W % 128 != 0)
    else:
        LC = (target_bytes // (sub * itemsize)) // 128 * 128
        LC = max(128, min(LC, (W // 128) * 128))
    # Row axis: as many timestep rows as the byte budget allows.
    if T2 <= sub:
        TT = T2  # equals the full array dim -> always a legal block shape
    else:
        TT = min(T2, max(sub, target_bytes // max(1, LC * itemsize)))
        TT = max(sub, (TT // sub) * sub)
    return TT, LC


def locked_dropout(x, dropout, training, seed=0):
    """x: (T, B, H). Matches LockedDropout.forward(x, dropout, training).

    NOTE: PyTorch draws a fresh mask every forward; thread a different `seed`
    per training step to reproduce that behavior.
    """
    if not training or dropout == 0.0:
        return x
    keep_prob = 1.0 - float(dropout)
    T, B, H = x.shape
    BH = B * H
    itemsize = jnp.dtype(x.dtype).itemsize

    # One mask for the whole sequence ("locked" across time), pre-scaled by
    # 1/(1-p), in x.dtype so the kernel multiply needs no casts.
    key = jax.random.PRNGKey(seed)
    keep = jax.random.bernoulli(key, p=keep_prob, shape=(1, BH))
    mask = keep.astype(x.dtype) * jnp.asarray(1.0 / keep_prob, dtype=x.dtype)

    # Lane-density repack: fold R consecutive timesteps into the lane dim when
    # B*H is narrow (free contiguous reshape; mask tiled R times).  Keeps the
    # output's last dim a large multiple of 128 -> unmasked full-width stores.
    R = 1
    if BH < 512:
        while (2 * R) * BH <= 4096 and T % (2 * R) == 0:
            R *= 2
    T2, W = T // R, R * BH
    x2 = x.reshape(T2, W)
    mask2 = jnp.tile(mask, (1, R)) if R > 1 else mask

    # Generation-aware block budget: ~vmem/8 per block keeps 2x(in) + 2x(out)
    # + mask comfortably inside VMEM on every chip generation
    # (v7x: 64 MiB -> ~8 MiB blocks; v5e/v6e: 128 MiB -> ~16 MiB blocks).
    vmem_cap = _vmem_capacity_bytes()
    target_bytes = int(min(16 << 20, max(2 << 20, vmem_cap // 8)))
    sub = _sublane_multiple(x.dtype)
    TT, LC = _pick_tiles(T2, W, itemsize, sub, target_bytes)

    # cdiv grid: partial last blocks are handled by Pallas, so no degenerate
    # whole-array fallback and no divisibility requirement on T or B*H.
    grid = (pl.cdiv(T2, TT), pl.cdiv(W, LC))

    # Raise the scoped-VMEM limit to cover double-buffered in/out blocks plus
    # the resident mask tile (default scoped limit is 16/32 MiB on v5e/v6e).
    block_bytes = TT * LC * itemsize
    mask_block_bytes = sub * LC * itemsize  # padded to a full sublane tile
    vmem_need = 4 * block_bytes + 2 * mask_block_bytes + (4 << 20)
    vmem_limit = int(min(vmem_cap, max(vmem_need, 32 << 20)))

    out = pl.pallas_call(
        _locked_dropout_kernel,
        out_shape=jax.ShapeDtypeStruct((T2, W), x.dtype),
        grid_spec=pl.GridSpec(
            grid=grid,
            in_specs=[
                # Mask: same row block every timestep-tile; only the lane index
                # varies, so it stays resident while x blocks stream through.
                pl.BlockSpec((1, LC), lambda t, c: (0, c)),
                # x: (TT, LC) tiles streamed along both grid axes.
                pl.BlockSpec((TT, LC), lambda t, c: (t, c)),
            ],
            out_specs=pl.BlockSpec((TT, LC), lambda t, c: (t, c)),
        ),
        compiler_params=pltpu.CompilerParams(
            # Every block is independent (mask is read-only): shard across both
            # TensorCores on v7x; harmless on single-TC v5e/v6e.
            dimension_semantics=("parallel", "parallel"),
            vmem_limit_bytes=vmem_limit,
        ),
    )(mask2, x2)
    return out.reshape(T, B, H)


if __name__ == "__main__":
    key = jax.random.PRNGKey(0)
    T, B, H = 8, 4, 32  # seq, batch, hidden
    x = jax.random.normal(key, (T, B, H), dtype=jnp.float32)

    dropout_p = 0.5

    # training=True path (mask applied)
    y = locked_dropout(x, dropout_p, training=True, seed=42)
    y = jax.block_until_ready(y)

    # sanity: mask is locked across time -> per-(b,h) ratio y/x is constant in t
    ratio = y / jnp.where(x == 0, 1.0, x)  # either 0 or 1/(1-p)
    locked = jnp.all(jnp.abs(ratio - ratio[0:1]) < 1e-5)
    valid_vals = jnp.all(
        (jnp.abs(ratio) < 1e-5) | (jnp.abs(ratio - 1.0 / (1.0 - dropout_p)) < 1e-4)
    )
    assert bool(locked), "mask not locked across time axis"
    assert bool(valid_vals), "mask values not in {0, 1/(1-p)}"

    # training=False path (identity)
    y_eval = jax.block_until_ready(locked_dropout(x, dropout_p, training=False))
    assert bool(jnp.all(y_eval == x))

    print("KERNEL_OK")
</pallas_src>

<mosaic_0001>
module attributes {stable_mosaic.version = 11 : i64} {
  func.func @_locked_dropout_kernel(%arg0: i32, %arg1: i32, %arg2: memref<1x1024xf32, #tpu.memory_space<vmem>>, %arg3: memref<1x1024xf32, #tpu.memory_space<vmem>>, %arg4: memref<1x1024xf32, #tpu.memory_space<vmem>>) attributes {dimension_semantics = [#tpu.dimension_semantics<parallel>, #tpu.dimension_semantics<parallel>], iteration_bounds = array<i64: 1, 1>, scalar_prefetch = 0 : i64, scratch_operands = 0 : i64, tpu.core_type = #tpu.core_type<tc>, window_params = [{transform_indices = @transform_0, window_bounds = array<i64: 1, 1024>}, {transform_indices = @transform_1, window_bounds = array<i64: 1, 1024>}, {transform_indices = @transform_2, window_bounds = array<i64: 1, 1024>}]} {
    %c0 = arith.constant 0 : index
    %c0_0 = arith.constant 0 : index
    %0 = vector.load %arg3[%c0, %c0_0] : memref<1x1024xf32, #tpu.memory_space<vmem>>, vector<1x1024xf32>
    %c0_1 = arith.constant 0 : index
    %c0_2 = arith.constant 0 : index
    %1 = vector.load %arg2[%c0_1, %c0_2] : memref<1x1024xf32, #tpu.memory_space<vmem>>, vector<1x1024xf32>
    %2 = arith.mulf %0, %1 : vector<1x1024xf32>
    %c0_3 = arith.constant 0 : index
    %c0_4 = arith.constant 0 : index
    %3 = vector.load %arg4[%c0_3, %c0_4] : memref<1x1024xf32, #tpu.memory_space<vmem>>, vector<1x1024xf32>
    tpu.vector_store %arg4[%c0_3, %c0_4], %2 {strides = array<i32>} : memref<1x1024xf32, #tpu.memory_space<vmem>>, vector<1x1024xf32>,
    return
  }
  func.func @transform_0(%arg0: i32, %arg1: i32) -> (i32, i32) {
    %c0_i32 = arith.constant 0 : i32
    %c0_i32_0 = arith.constant 0 : i32
    return %c0_i32, %arg1 : i32, i32
  }
  func.func @transform_1(%arg0: i32, %arg1: i32) -> (i32, i32) {
    %c0_i32 = arith.constant 0 : i32
    return %arg0, %arg1 : i32, i32
  }
  func.func @transform_2(%arg0: i32, %arg1: i32) -> (i32, i32) {
    %c0_i32 = arith.constant 0 : i32
    return %arg0, %arg1 : i32, i32
  }
}

</mosaic_0001>

<bundles_post_ra>
// kernel: tpu_custom_call.1
= control target key start
LH: loop header
LB: loop body
LE: loop exit
PB: predicated region body
PF: predicated region fallthrough
CT: control target
= control target key end

     0   :  { %7 = vsyncpa [#allocation3], 0  ;;  %s185_s0 = inlined_call_operand.hbm [shape: f32[1,1024], index: 0, kind: input, shape index: {}]   ;;  %s186_s1 = inlined_call_operand.hbm [shape: f32[1,1024], index: 1, kind: input, shape index: {}]   ;;  %s187_s2 = inlined_call_operand.hbm [shape: f32[1,1024], index: 2, kind: output, shape index: {}]  }
   0x1   :  { %8 = vsyncpa [#allocation6], 0 }
   0x2   :  { %9 = vsyncpa [#allocation4], 0  ;;  %s131_s9 = smov [#allocation2]   ;;  %s132_s11 = smov [#allocation5]  }
   0x3   :  { %s16_s10 = sshll.u32 %s131_s9, 4  ;;  %s26_s12 = sshll.u32 %s132_s11, 4  ;;  %s17_s10 = int_to_ptr.vmem [resolvable:$true] %s16_s10  ;;  %s27_s12 = int_to_ptr.vmem [resolvable:$true] %s26_s12 }
   0x4   :  { %s59_s15 = scalar_lea.hbm %s185_s0, 128 }
   0x5   :  { %p60_p0 = scmp.ne.s32.totalorder %s185_s0, %s59_s15  ;;  %p63_p1 = scmp.lt.u32.totalorder %s59_s15, %s185_s0 }
   0x7   :  { %p65_p2 = pnand %p63_p1, %p60_p0 }
   0x9   :  { %68 = shalt.err (!%p65_p2)
}
   0xa   :  { %s69_s20 = scalar_lea.vmem %s17_s10, 128  ;;  %p74_p4 = scmp.lt.s32.totalorder %s17_s10, %s17_s10 }
   0xb   :  { %p70_p3 = scmp.ne.s32.totalorder %s17_s10, %s69_s20  ;;  %p75_p5 = scmp.lt.s32.totalorder %s69_s20, %s69_s20 }
   0xd   :  { %p76_p6 = por %p75_p5, %p74_p4 }
   0xf   :  { %p77_p7 = pnand %p76_p6, %p70_p3 }
  0x11   :  { %80 = shalt.err (!%p77_p7)
}
  0x12   :  { %19 = dma.hbm_to_vmem [thread:$0]  %s185_s0, 128, %s17_s10, [#allocation3]  }
  0x13   :  { %s81_s25 = scalar_lea.hbm %s186_s1, 128 }
  0x14   :  { %p82_p8 = scmp.ne.s32.totalorder %s186_s1, %s81_s25  ;;  %p85_p9 = scmp.lt.u32.totalorder %s81_s25, %s186_s1 }
  0x16   :  { %p87_p10 = pnand %p85_p9, %p82_p8 }
  0x18   :  { %90 = shalt.err (!%p87_p10)
}
  0x19   :  { %s91_s30 = scalar_lea.vmem %s27_s12, 128  ;;  %p96_p12 = scmp.lt.s32.totalorder %s27_s12, %s27_s12 }
  0x1a   :  { %p92_p11 = scmp.ne.s32.totalorder %s27_s12, %s91_s30  ;;  %p97_p13 = scmp.lt.s32.totalorder %s91_s30, %s91_s30 }
  0x1c   :  { %p98_p0 = por %p97_p13, %p96_p12 }
  0x1e   :  { %p99_p1 = pnand %p98_p0, %p92_p11 }
  0x20   :  { %102 = shalt.err (!%p99_p1)
}
  0x21   :  { %29 = dma.hbm_to_vmem [thread:$0]  %s186_s1, 128, %s27_s12, [#allocation6]  }
  0x22   :  { %125 = dma.done.wait [#allocation3], 128  }
  0x23   :  { %126 = vsyncadd [#allocation3], 4294967168 }
  0x24   :  { %127 = dma.done.wait [#allocation6], 128  }
  0x25   :  { %128 = vsyncadd [#allocation6], 4294967168  ;;  %s133_s4 = smov [#allocation7]   ;;  %v36_v0 = vld [vmem:[#allocation5] sm:$0xff]  ;;  %v37_v1 = vld [vmem:[#allocation2] sm:$0xff] }
  0x26   :  { %s46_s5 = sshll.u32 %s133_s4, 4  ;;  %v38_v2 = vmul.f32 %v37_v1, %v36_v0  ;;  %s47_s5 = int_to_ptr.vmem [resolvable:$true] %s46_s5 }
  0x27   :  { %s103_s6 = scalar_lea.vmem %s47_s5, 128  ;;  %p108_p3 = scmp.lt.s32.totalorder %s47_s5, %s47_s5 }
  0x28   :  { %39 = vst [vmem:[#allocation7] sm:$0xff] %v38_v2  ;;  %p104_p2 = scmp.ne.s32.totalorder %s47_s5, %s103_s6  ;;  %p109_p4 = scmp.lt.s32.totalorder %s103_s6, %s103_s6 }
  0x2a   :  { %p110_p5 = por %p109_p4, %p108_p3 }
  0x2c   :  { %p111_p6 = pnand %p110_p5, %p104_p2 }
  0x2e   :  { %114 = shalt.err (!%p111_p6)
}
  0x2f   :  { %s115_s8 = scalar_lea.hbm %s187_s2, 128 }
  0x30   :  { %p116_p7 = scmp.ne.s32.totalorder %s187_s2, %s115_s8  ;;  %p119_p8 = scmp.lt.u32.totalorder %s115_s8, %s187_s2 }
  0x32   :  { %p121_p9 = pnand %p119_p8, %p116_p7 }
  0x34   :  { %124 = shalt.err (!%p121_p9)
}
  0x35   :  { %49 = dma.vmem_to_hbm [thread:$0]  %s47_s5, 128, %s187_s2, [#allocation4]  }
  0x36   :  { %129 = dma.done.wait [#allocation4], 128  }
  0x37   :  { %130 = vsyncadd [#allocation4], 4294967168 }
  0x38   :  { %53 = vsyncpa [#allocation3], 1 }
  0x39   :  { %54 = vsyncpa [#allocation6], 1 }
  0x3a   :  { %55 = vsyncpa [#allocation4], 1 }

</bundles_post_ra>
